<compile_context>
chip_gen: v6e
topology: v6e:2x2x1
jax: 0.10.0
libtpu: 0.0.40
codegen_flags: <defaults>
</compile_context>

<pallas_src>
import math

import jax
import jax.numpy as jnp
from jax.experimental import pallas as pl
from jax.experimental.pallas import tpu as pltpu

_LANE = 128
# Per-block byte budget for one x (and one out) tile.  With default double
# buffering the x+out tiles cost ~4x this (~12 MiB), which fits every
# generation's scoped-VMEM default without tuning.
_BLOCK_BUDGET_BYTES = 3 * 1024 * 1024
_TILE_F_CAP = 8192  # max lanes per feature tile


def _sublane_multiple(dtype):
    # Sub-32-bit dtypes pack along sublanes: f32 -> 8, bf16 -> 16, int8/fp8 -> 32.
    itemsize = jnp.dtype(dtype).itemsize
    return 8 * max(1, 4 // itemsize)


def _choose_tiles(B, F, dtype):
    itemsize = jnp.dtype(dtype).itemsize
    sub = _sublane_multiple(dtype)

    # Feature tile: keep full F when it is small (or not lane-aligned, since a
    # partial block's last dim must be a multiple of 128); otherwise use a
    # large lane-dense multiple of 128.
    if F <= _TILE_F_CAP or F % _LANE != 0:
        tile_f = F
    else:
        tile_f = _TILE_F_CAP

    # Batch tile: as many rows as fit the per-block budget, in whole packed
    # vregs (multiples of `sub`); use the full batch when it is small.
    rows = _BLOCK_BUDGET_BYTES // max(1, tile_f * itemsize)
    tile_b = max(sub, (rows // sub) * sub)
    if tile_b >= B:
        tile_b = B
    return tile_b, tile_f


def _dot_product_kernel(x_ref, w_ref, o_ref):
    # x_ref: (TB, TF) tile of the input, w_ref: (1, TF) slice of the weight row.
    # Broadcast the weight row over the batch-tile rows and multiply (VPU).
    o_ref[...] = x_ref[...] * w_ref[...]


def dot_product(x, weight, *, tile_b=None, tile_f=None):
    """x: (B, F), weight: (F,) -> (B, F) = x * weight (broadcast over batch).

    Remainder tiles (B % tile_b != 0 or F % tile_f != 0) rely on Pallas block
    padding: padded rows/lanes are multiplied but their writes are masked, which
    is safe for this purely elementwise op.
    """
    B, F = x.shape
    assert weight.shape == (F,)
    w2d = weight.reshape(1, F).astype(x.dtype)

    auto_b, auto_f = _choose_tiles(B, F, x.dtype)
    tile_b = auto_b if tile_b is None else min(tile_b, B)
    tile_f = auto_f if tile_f is None else min(tile_f, F)

    grid = (pl.cdiv(B, tile_b), pl.cdiv(F, tile_f))
    return pl.pallas_call(
        _dot_product_kernel,
        out_shape=jax.ShapeDtypeStruct((B, F), x.dtype),
        grid_spec=pltpu.PrefetchScalarGridSpec(
            num_scalar_prefetch=0,
            grid=grid,
            in_specs=[
                pl.BlockSpec((tile_b, tile_f), lambda i, j: (i, j)),
                pl.BlockSpec((1, tile_f), lambda i, j: (0, j)),  # weight reused per batch tile
            ],
            out_specs=pl.BlockSpec((tile_b, tile_f), lambda i, j: (i, j)),
        ),
        compiler_params=pltpu.CompilerParams(
            dimension_semantics=("parallel", "parallel"),
            vmem_limit_bytes=32 * 1024 * 1024,
        ),
    )(x, w2d)
    # TODO(synk): at tiny standalone sizes (e.g. 16x128) the launch/DMA setup
    # dominates; prefer fusing this multiply into the surrounding XLA graph.


if __name__ == "__main__":
    # Module config (synthetic, deterministic init matching reset_parameters()).
    in_features = 128
    batch = 16

    key = jax.random.PRNGKey(0)
    kx, kw, kx2, kw2 = jax.random.split(key, 4)

    # weight ~ U(-stdv, stdv), stdv = 1/sqrt(in_features)  (matches PyTorch init)
    stdv = 1.0 / math.sqrt(in_features)
    weight = jax.random.uniform(
        kw, (in_features,), minval=-stdv, maxval=stdv, dtype=jnp.float32
    )
    x = jax.random.normal(kx, (batch, in_features), dtype=jnp.float32)

    out = dot_product(x, weight)
    out = jax.block_until_ready(out)

    ref = x * weight[None, :]
    assert out.shape == x.shape and out.dtype == x.dtype
    assert jnp.allclose(out, ref, atol=1e-6, rtol=1e-6)

    # Second check: force a multi-tile grid with batch/feature remainders to
    # exercise padded partial blocks (masked writes).
    B2, F2 = 20, 256
    stdv2 = 1.0 / math.sqrt(F2)
    weight2 = jax.random.uniform(kw2, (F2,), minval=-stdv2, maxval=stdv2, dtype=jnp.float32)
    x2 = jax.random.normal(kx2, (B2, F2), dtype=jnp.float32)
    out2 = jax.block_until_ready(dot_product(x2, weight2, tile_b=8, tile_f=128))
    assert jnp.allclose(out2, x2 * weight2[None, :], atol=1e-6, rtol=1e-6)

    print("KERNEL_OK")
</pallas_src>

<mosaic_0001>
module attributes {stable_mosaic.version = 11 : i64} {
  func.func @_dot_product_kernel(%arg0: i32, %arg1: i32, %arg2: memref<16x128xf32, #tpu.memory_space<vmem>>, %arg3: memref<1x128xf32, #tpu.memory_space<vmem>>, %arg4: memref<16x128xf32, #tpu.memory_space<vmem>>) attributes {dimension_semantics = [#tpu.dimension_semantics<parallel>, #tpu.dimension_semantics<parallel>], iteration_bounds = array<i64: 1, 1>, scalar_prefetch = 0 : i64, scratch_operands = 0 : i64, tpu.core_type = #tpu.core_type<tc>, window_params = [{transform_indices = @transform_0, window_bounds = array<i64: 16, 128>}, {transform_indices = @transform_1, window_bounds = array<i64: 1, 128>}, {transform_indices = @transform_2, window_bounds = array<i64: 16, 128>}]} {
    %c0 = arith.constant 0 : index
    %c0_0 = arith.constant 0 : index
    %0 = vector.load %arg2[%c0, %c0_0] : memref<16x128xf32, #tpu.memory_space<vmem>>, vector<16x128xf32>
    %c0_1 = arith.constant 0 : index
    %c0_2 = arith.constant 0 : index
    %1 = vector.load %arg3[%c0_1, %c0_2] : memref<1x128xf32, #tpu.memory_space<vmem>>, vector<1x128xf32>
    %2 = vector.broadcast %1 : vector<1x128xf32> to vector<16x128xf32>
    %3 = arith.mulf %0, %2 : vector<16x128xf32>
    %c0_3 = arith.constant 0 : index
    %c0_4 = arith.constant 0 : index
    %4 = vector.load %arg4[%c0_3, %c0_4] : memref<16x128xf32, #tpu.memory_space<vmem>>, vector<16x128xf32>
    tpu.vector_store %arg4[%c0_3, %c0_4], %3 {strides = array<i32>} : memref<16x128xf32, #tpu.memory_space<vmem>>, vector<16x128xf32>,
    return
  }
  func.func @transform_0(%arg0: i32, %arg1: i32) -> (i32, i32) {
    %c0_i32 = arith.constant 0 : i32
    return %arg0, %arg1 : i32, i32
  }
  func.func @transform_1(%arg0: i32, %arg1: i32) -> (i32, i32) {
    %c0_i32 = arith.constant 0 : i32
    %c0_i32_0 = arith.constant 0 : i32
    return %c0_i32, %arg1 : i32, i32
  }
  func.func @transform_2(%arg0: i32, %arg1: i32) -> (i32, i32) {
    %c0_i32 = arith.constant 0 : i32
    return %arg0, %arg1 : i32, i32
  }
}

</mosaic_0001>

<bundles_post_ra>
// kernel: tpu_custom_call.1
= control target key start
LH: loop header
LB: loop body
LE: loop exit
PB: predicated region body
PF: predicated region fallthrough
CT: control target
= control target key end

     0   :  { %7 = vsyncpa [#allocation3], 0  ;;  %s133_s0 = inlined_call_operand.hbm [shape: f32[16,128], index: 0, kind: input, shape index: {}]   ;;  %s134_s1 = inlined_call_operand.vmem [shape: f32[1,128], index: 1, kind: input, shape index: {}]   ;;  %s135_s2 = inlined_call_operand.hbm [shape: f32[16,128], index: 2, kind: output, shape index: {}]  }
   0x1   :  { %8 = vsyncpa [#allocation4], 0  ;;  %s105_s9 = smov [#allocation2]  }
   0x2   :  { %s14_s10 = sshll.u32 %s105_s9, 4  ;;  %s15_s10 = int_to_ptr.vmem [resolvable:$true] %s14_s10 }
   0x3   :  { %s69_s11 = scalar_lea.vmem %s15_s10, 256  ;;  %p74_p1 = scmp.lt.s32.totalorder %s15_s10, %s15_s10 }
   0x4   :  { %p70_p0 = scmp.ne.s32.totalorder %s15_s10, %s69_s11  ;;  %p75_p2 = scmp.lt.s32.totalorder %s69_s11, %s69_s11 }
   0x6   :  { %p76_p3 = por %p75_p2, %p74_p1 }
   0x8   :  { %p77_p4 = pnand %p76_p3, %p70_p0 }
   0xa   :  { %80 = shalt.err (!%p77_p4)
}
   0xb   :  { %s106_s12 = smov 128   ;;  %s107_s13 = smov 8  }
   0xc   :  { %20 = dma.hbm_to_vmem [thread:$0]  %s133_s0, 256, %s15_s10, [#allocation3], %s106_s12, %s106_s12, %s107_s13  }
   0xd   :  { %101 = dma.done.wait [#allocation3], 256  }
   0xe   :  { %102 = vsyncadd [#allocation3], 4294967040  ;;  %s108_s16 = smov [#allocation5]   ;;  %v26_v0 = vld [vmem:[#allocation2] sm:$0xff]  ;;  %v27_v2 = vld [vmem:[#allocation2 + $0x8] sm:$0xff] }
   0xf   :  { %s44_s17 = sshll.u32 %s108_s16, 4  ;;  %v56_v1 = vld [vmem:[%s134_s1] ss:$0 sm:$0xff]  ;;  %s45_s17 = int_to_ptr.vmem [resolvable:$true] %s44_s17 }
  0x10   :  { %v35_v3 = vmul.f32 %v56_v1, %v26_v0  ;;  %v36_v4 = vmul.f32 %v56_v1, %v27_v2  ;;  %s81_s20 = scalar_lea.vmem %s45_s17, 256  ;;  %p86_p6 = scmp.lt.s32.totalorder %s45_s17, %s45_s17 }
  0x11   :  { %p82_p5 = scmp.ne.s32.totalorder %s45_s17, %s81_s20  ;;  %p87_p7 = scmp.lt.s32.totalorder %s81_s20, %s81_s20 }
  0x12   :  { %37 = vst [vmem:[#allocation5] sm:$0xff] %v35_v3  ;;  %38 = vst [vmem:[#allocation5 + $0x8] sm:$0xff] %v36_v4 }
  0x13   :  { %p88_p8 = por %p87_p7, %p86_p6 }
  0x15   :  { %p89_p9 = pnand %p88_p8, %p82_p5 }
  0x17   :  { %92 = shalt.err (!%p89_p9)
}
  0x18   :  { %50 = dma.vmem_to_hbm [thread:$0]  %s45_s17, 256, %s135_s2, [#allocation4], %s106_s12, %s106_s12, %s107_s13  }
  0x19   :  { %103 = dma.done.wait [#allocation4], 256  }
  0x1a   :  { %104 = vsyncadd [#allocation4], 4294967040 }
  0x1b   :  { %54 = vsyncpa [#allocation3], 1 }
  0x1c   :  { %55 = vsyncpa [#allocation4], 1 }

</bundles_post_ra>
